<compile_context>
chip_gen: v5e
topology: v5e:2x2
jax: 0.10.0
libtpu: 0.0.40
codegen_flags: <defaults>
</compile_context>

<pallas_src>
import math

import jax
import jax.numpy as jnp
from jax import lax
from jax.experimental import pallas as pl
from jax.experimental.pallas import tpu as pltpu


def _conv_cd_kernel(x_ref, b_ref, o_ref):
    # Block shapes:
    #   x_ref : (1, H+2, (W+2)*Cin)   padded image slab
    #   b_ref : (3, (W+2)*Cin, W*Cout) block-Toeplitz weights (theta folded in)
    #   o_ref : (1, H, W*Cout)
    H = o_ref.shape[1]

    # kh = 0 tap initializes the accumulator; kh = 1, 2 accumulate.
    acc = jnp.dot(x_ref[0, pl.ds(0, H), :], b_ref[0],
                  preferred_element_type=jnp.float32)
    for kh in range(1, 3):
        acc = acc + jnp.dot(x_ref[0, pl.ds(kh, H), :], b_ref[kh],
                            preferred_element_type=jnp.float32)

    o_ref[0] = acc.astype(o_ref.dtype)


def _toeplitz_weights(w_hwio, theta, W):
    """Build B[kh] of shape ((W+2)*Cin, W*Cout) s.t.

        (x_slab[h+kh, :] @ B[kh])[w*Cout + co]
            = sum_{kw, ci} xpad[h+kh, w+kw, ci] * W'[kh, kw, ci, co]

    with the central-difference term folded into the center tap.
    """
    KH, KW, Cin, Cout = w_hwio.shape
    wf = w_hwio
    if abs(theta) >= 1e-8:
        wsum = jnp.sum(w_hwio, axis=(0, 1))                 # (Cin, Cout)
        wf = wf.at[1, 1].add(-jnp.asarray(theta, w_hwio.dtype) * wsum)

    eye = jnp.eye(W, dtype=w_hwio.dtype)
    bs = []
    for kh in range(KH):
        b = jnp.zeros(((W + 2) * Cin, W * Cout), w_hwio.dtype)
        for kw in range(KW):
            # Block-diagonal with wf[kh, kw] on the diagonal, shifted down by
            # kw channel-blocks:  B[(w+kw)*Cin + ci, w*Cout + co] = wf[kh,kw,ci,co]
            bd = jnp.kron(eye, wf[kh, kw])                   # (W*Cin, W*Cout)
            b = b + jnp.pad(bd, ((kw * Cin, (KW - 1 - kw) * Cin), (0, 0)))
        bs.append(b)
    return jnp.stack(bs, axis=0)                             # (3, (W+2)*Cin, W*Cout)


def conv2d_cd(x_nchw, weight_oihw, theta=0.0):
    """x_nchw: (N, Cin, H, W) float32; weight_oihw: (Cout, Cin, 3, 3)."""
    N, Cin, H, W = x_nchw.shape
    Cout, Cin_w, KH, KW = weight_oihw.shape
    assert (KH, KW) == (3, 3) and Cin_w == Cin

    # --- wrapper glue: layout, zero padding, weight transform (traced once) ---
    x_nhwc = jnp.transpose(x_nchw, (0, 2, 3, 1))                     # (N,H,W,C)
    x_pad = jnp.pad(x_nhwc, ((0, 0), (1, 1), (1, 1), (0, 0)))        # (N,H+2,W+2,C)
    x_slab = x_pad.reshape(N, H + 2, (W + 2) * Cin)                  # (N,H+2,(W+2)*Cin)

    w_hwio = jnp.transpose(weight_oihw, (2, 3, 1, 0))                # (3,3,Cin,Cout)
    b = _toeplitz_weights(w_hwio, float(theta), W)                   # (3,(W+2)*Cin,W*Cout)

    L = (W + 2) * Cin
    NO = W * Cout

    out_slab = pl.pallas_call(
        _conv_cd_kernel,
        out_shape=jax.ShapeDtypeStruct((N, H, NO), x_nchw.dtype),
        grid_spec=pltpu.PrefetchScalarGridSpec(
            num_scalar_prefetch=0,
            grid=(N,),
            in_specs=[
                pl.BlockSpec((1, H + 2, L), lambda n: (n, 0, 0)),
                # constant index_map -> weights stay resident in VMEM across steps
                pl.BlockSpec((3, L, NO), lambda n: (0, 0, 0)),
            ],
            out_specs=pl.BlockSpec((1, H, NO), lambda n: (n, 0, 0)),
        ),
        compiler_params=pltpu.CompilerParams(
            dimension_semantics=("parallel",),
            vmem_limit_bytes=32 * 1024 * 1024,
        ),
    )(x_slab, b)

    out_nhwc = out_slab.reshape(N, H, W, Cout)
    return jnp.transpose(out_nhwc, (0, 3, 1, 2))                     # back to NCHW


def _reference(x_nchw, weight_oihw, theta):
    dn = ("NCHW", "OIHW", "NCHW")
    out_normal = lax.conv_general_dilated(
        x_nchw, weight_oihw, window_strides=(1, 1),
        padding=((1, 1), (1, 1)), dimension_numbers=dn)
    if math.fabs(theta - 0.0) < 1e-8:
        return out_normal
    kernel_diff = jnp.sum(weight_oihw, axis=(2, 3), keepdims=True)
    out_diff = lax.conv_general_dilated(
        x_nchw, kernel_diff, window_strides=(1, 1),
        padding=((0, 0), (0, 0)), dimension_numbers=dn)
    return out_normal - theta * out_diff


if __name__ == "__main__":
    # Deterministic parameters / inputs (synthetic, no checkpoint).
    N, Cin, Cout, H, W, K = 2, 4, 8, 16, 16, 3
    theta = 0.7

    key = jax.random.PRNGKey(0)
    kx, kw = jax.random.split(key)
    x = jax.random.normal(kx, (N, Cin, H, W), dtype=jnp.float32)
    # kaiming_init: randn(c_out, c_in, k, k) * sqrt(2 / c_in)
    weight = jax.random.normal(kw, (Cout, Cin, K, K), dtype=jnp.float32) \
             * math.sqrt(2.0 / Cin)

    out = conv2d_cd(x, weight, theta=theta)
    out = jax.block_until_ready(out)

    ref = _reference(x, weight, theta)
    assert out.shape == ref.shape == (N, Cout, H, W)
    assert jnp.allclose(out, ref, atol=1e-4, rtol=1e-4), \
        float(jnp.max(jnp.abs(out - ref)))

    # also check the theta == 0 path
    out0 = jax.block_until_ready(conv2d_cd(x, weight, theta=0.0))
    ref0 = _reference(x, weight, 0.0)
    assert jnp.allclose(out0, ref0, atol=1e-4, rtol=1e-4)

    print("KERNEL_OK")
</pallas_src>

<mosaic_0001>
module attributes {stable_mosaic.version = 11 : i64} {
  func.func @_conv_cd_kernel(%arg0: i32, %arg1: memref<1x18x72xf32, #tpu.memory_space<vmem>>, %arg2: memref<3x72x128xf32, #tpu.memory_space<vmem>>, %arg3: memref<1x16x128xf32, #tpu.memory_space<vmem>>) attributes {dimension_semantics = [#tpu.dimension_semantics<parallel>], iteration_bounds = array<i64: 2>, scalar_prefetch = 0 : i64, scratch_operands = 0 : i64, tpu.core_type = #tpu.core_type<tc>, window_params = [{transform_indices = @transform_0, window_bounds = array<i64: 1, 18, 72>}, {pipeline_mode = #tpu.pipeline_mode<synchronous>, transform_indices = @transform_1, window_bounds = array<i64: 3, 72, 128>}, {transform_indices = @transform_2, window_bounds = array<i64: 1, 16, 128>}]} {
    %c0 = arith.constant 0 : index
    %c0_0 = arith.constant 0 : index
    %c0_1 = arith.constant 0 : index
    %0 = vector.load %arg1[%c0, %c0_0, %c0_1] : memref<1x18x72xf32, #tpu.memory_space<vmem>>, vector<1x16x72xf32>
    %1 = vector.shape_cast %0 : vector<1x16x72xf32> to vector<16x72xf32>
    %c0_2 = arith.constant 0 : index
    %c0_3 = arith.constant 0 : index
    %c0_4 = arith.constant 0 : index
    %2 = vector.load %arg2[%c0_2, %c0_3, %c0_4] : memref<3x72x128xf32, #tpu.memory_space<vmem>>, vector<1x72x128xf32>
    %3 = vector.shape_cast %2 : vector<1x72x128xf32> to vector<72x128xf32>
    %cst = arith.constant dense<0.000000e+00> : vector<16x128xf32>
    %4 = tpu.matmul %1, %3, %cst {dimension_numbers = #tpu.dot_dimension_numbers<[1], [0], [0], [1], [0, 0, 1, 1], [], []>} : vector<16x72xf32>, vector<72x128xf32>, vector<16x128xf32> -> vector<16x128xf32>
    %c0_5 = arith.constant 0 : index
    %c1 = arith.constant 1 : index
    %c0_6 = arith.constant 0 : index
    %5 = vector.load %arg1[%c0_5, %c1, %c0_6] : memref<1x18x72xf32, #tpu.memory_space<vmem>>, vector<1x16x72xf32>
    %6 = vector.shape_cast %5 : vector<1x16x72xf32> to vector<16x72xf32>
    %c1_7 = arith.constant 1 : index
    %c0_8 = arith.constant 0 : index
    %c0_9 = arith.constant 0 : index
    %7 = vector.load %arg2[%c1_7, %c0_8, %c0_9] : memref<3x72x128xf32, #tpu.memory_space<vmem>>, vector<1x72x128xf32>
    %8 = vector.shape_cast %7 : vector<1x72x128xf32> to vector<72x128xf32>
    %cst_10 = arith.constant dense<0.000000e+00> : vector<16x128xf32>
    %9 = tpu.matmul %6, %8, %cst_10 {dimension_numbers = #tpu.dot_dimension_numbers<[1], [0], [0], [1], [0, 0, 1, 1], [], []>} : vector<16x72xf32>, vector<72x128xf32>, vector<16x128xf32> -> vector<16x128xf32>
    %10 = arith.addf %4, %9 : vector<16x128xf32>
    %c0_11 = arith.constant 0 : index
    %c2 = arith.constant 2 : index
    %c0_12 = arith.constant 0 : index
    %11 = vector.load %arg1[%c0_11, %c2, %c0_12] : memref<1x18x72xf32, #tpu.memory_space<vmem>>, vector<1x16x72xf32>
    %12 = vector.shape_cast %11 : vector<1x16x72xf32> to vector<16x72xf32>
    %c2_13 = arith.constant 2 : index
    %c0_14 = arith.constant 0 : index
    %c0_15 = arith.constant 0 : index
    %13 = vector.load %arg2[%c2_13, %c0_14, %c0_15] : memref<3x72x128xf32, #tpu.memory_space<vmem>>, vector<1x72x128xf32>
    %14 = vector.shape_cast %13 : vector<1x72x128xf32> to vector<72x128xf32>
    %cst_16 = arith.constant dense<0.000000e+00> : vector<16x128xf32>
    %15 = tpu.matmul %12, %14, %cst_16 {dimension_numbers = #tpu.dot_dimension_numbers<[1], [0], [0], [1], [0, 0, 1, 1], [], []>} : vector<16x72xf32>, vector<72x128xf32>, vector<16x128xf32> -> vector<16x128xf32>
    %16 = arith.addf %10, %15 : vector<16x128xf32>
    %c0_17 = arith.constant 0 : index
    %c0_18 = arith.constant 0 : index
    %c0_19 = arith.constant 0 : index
    %17 = vector.load %arg3[%c0_17, %c0_18, %c0_19] : memref<1x16x128xf32, #tpu.memory_space<vmem>>, vector<1x16x128xf32>
    %18 = vector.shape_cast %17 : vector<1x16x128xf32> to vector<16x128xf32>
    %19 = vector.shape_cast %16 : vector<16x128xf32> to vector<1x16x128xf32>
    tpu.vector_store %arg3[%c0_17, %c0_18, %c0_19], %19 {strides = array<i32>} : memref<1x16x128xf32, #tpu.memory_space<vmem>>, vector<1x16x128xf32>,
    return
  }
  func.func @transform_0(%arg0: i32) -> (i32, i32, i32) {
    %c0_i32 = arith.constant 0 : i32
    %c0_i32_0 = arith.constant 0 : i32
    %c0_i32_1 = arith.constant 0 : i32
    return %arg0, %c0_i32, %c0_i32_0 : i32, i32, i32
  }
  func.func @transform_1(%arg0: i32) -> (i32, i32, i32) {
    %c0_i32 = arith.constant 0 : i32
    %c0_i32_0 = arith.constant 0 : i32
    %c0_i32_1 = arith.constant 0 : i32
    %c0_i32_2 = arith.constant 0 : i32
    return %c0_i32, %c0_i32_0, %c0_i32_1 : i32, i32, i32
  }
  func.func @transform_2(%arg0: i32) -> (i32, i32, i32) {
    %c0_i32 = arith.constant 0 : i32
    %c0_i32_0 = arith.constant 0 : i32
    %c0_i32_1 = arith.constant 0 : i32
    return %arg0, %c0_i32, %c0_i32_0 : i32, i32, i32
  }
}

</mosaic_0001>

<bundles_post_ra>
// kernel: tpu_custom_call.1
= control target key start
LH: loop header
LB: loop body
LE: loop exit
PB: predicated region body
PF: predicated region fallthrough
CT: control target
= control target key end

     0   :  { %7 = vsyncpa [#allocation3], 0  ;;  %s684_s0 = inlined_call_operand.vmem [shape: f32[2,18,72], index: 0, kind: input, shape index: {}]   ;;  %s685_s1 = inlined_call_operand.hbm [shape: f32[3,72,128], index: 1, kind: input, shape index: {}]   ;;  %s686_s2 = inlined_call_operand.hbm [shape: f32[2,16,128], index: 2, kind: output, shape index: {}]  }
   0x1   :  { %8 = vsyncpa [#allocation4], 0 }
   0x2   :  { %10 = vsyncpa [#allocation4 + $0x1], 0  ;;  %s578_s9 = smov 0   ;;  %s580_s10 = smov 0  }
   0x3   :  { %s582_s11 = smov 0   ;;  %s584_s12 = smov 0  }
   0x4 LB: > { %s599_s13 = sadd.s32 4294967295, %s556_s12   ;;  %s376_s14 = sadd.s32 4294967294, %s556_s12   ;;  %s556_s12 = sphi %s584_s12, %s692_s12   ;;  %s552_s11 = sphi %s582_s11, %s691_s11   ;;  %s548_s10 = sphi %s580_s10, %s690_s10   ;;  %s544_s9 = sphi %s578_s9, %s689_s9  }
   0x5   : > { %s603_s15 = sadd.s32 1, %s556_s12   ;;  %s70_s16 = sadd.s32 1, %s552_s11 }
   0x6   : > { %s67_s17 = ssub.s32 %s556_s12, %s603_s15  ;;  %p80_p0 = scmp.ne.s32.totalorder %s552_s11, %s548_s10 }
   0x7   : > { %p68_p1 = scmp.eq.s32.totalorder %s67_s17, 0  ;;  %p81_p2 = scmp.eq.s32.totalorder %s599_s13, 1 }
   0x8   : > { %p86_p3 = scmp.ne.s32.totalorder %s548_s10, %s544_s9  ;;  %p87_p4 = scmp.eq.s32.totalorder %s376_s14, 1 }
   0x9   : > { %s614_s18 = scalar_select %p68_p1, %s552_s11, %s70_s16  }
   0xa   : > { %p616_p5 = por %p81_p2, %p80_p0  ;;  %p620_p6 = por %p87_p4, %p86_p3 }
   0xb   : > { %p377_p7 = scmp.ge.s32.totalorder %s556_s12, 1  ;;  %p94_p8 = scmp.lt.s32.totalorder %s556_s12, 3 }
   0xc   : > { %p420_p9 = scmp.eq.s32.totalorder %s599_s13, 0  ;;  %s105_s23 = sshll.u32 %s685_s1, 4  ;;  %s106_s23 = int_to_ptr.hbm [resolvable:$true] %s105_s23 }
   0xd   : > { %p95_p10 = pnand %p377_p7, %p94_p8  ;;  %s558_s24 = smov [#allocation2]  }
   0xe   : > { %s107_s25 = sshll.u32 %s558_s24, 4  ;;  %s559_s26 = smov 128   ;;  %s108_s25 = int_to_ptr.vmem [resolvable:$true] %s107_s25 }
   0xf   : > { %p412_p11 = pneg %p95_p10  ;;  %s560_s27 = smov 8  }
  0x10   : > { %131 = sbr.rel (%p95_p10) target bundleno = 186 (0xba), region = 28 }
  0x11   : > { %p413_p12 = pnand %p420_p9, %p412_p11 }
  0x13   : > { %415 = dma.hbm_to_vmem [thread:$0]  (!%p413_p12), %s106_s23, 3456, %s108_s25, [#allocation3], %s559_s26, %s559_s26, %s560_s27  }
  0x15   : > { %535 = dma.done.wait (%p420_p9), [#allocation3], 3456  }
  0x16   : > { %537 = vsyncadd (%p420_p9), [#allocation3], 4294963840  ;;  %v252_v0 = vld [vmem:[#allocation2 + $0xd0] sm:$0xff]  ;;  %v251_v1 = vld [vmem:[#allocation2 + $0xc8] sm:$0xff]  ;;  %p154_p13 = scmp.lt.s32.totalorder %s599_s13, 1  ;;  %vm182_vm0 = vcmask 588800  }
  0x17   : > { %v181_v2 = vld [vmem:[#allocation2 + $0x88] sm:$0xff]  ;;  %266 = vmatpush.msra.mxu2 %v252_v0  ;;  %v169_v3 = vld [vmem:[#allocation2 + $0x40] sm:$0xff]  ;;  %v168_v6 = vld [vmem:[#allocation2 + $0x38] sm:$0xff]  ;;  %s151_s5 = sand.u32 1, %s548_s10   ;;  %s395_s7 = sshll.u32 %s599_s13, 4 }
  0x18   : > { %196 = vmatpush.msra.mxu0 %v181_v2  ;;  %v180_v4 = vld [vmem:[#allocation2 + $0x80] sm:$0xff]  ;;  %225 = vmatpush.msra.mxu1 %v169_v3  ;;  %v179_v7 = vld [vmem:[#allocation2 + $0x78] sm:$0xff]  ;;  %v167_v8 = vld [vmem:[#allocation2 + $0x30] sm:$0xff]  ;;  %s640_s28 = scalar_select %p154_p13, %s599_s13, 1 }
  0x19   : > { %v250_v5 = vld [vmem:[#allocation2 + $0xc0] sm:$0xff]  ;;  %396 = vmatpush.msra.mxu3 %v181_v2  ;;  %267 = vmatpush.msra.mxu2 %v251_v1  ;;  %v249_v9 = vld [vmem:[#allocation2 + $0xb8] sm:$0xff]  ;;  %v178_v10 = vld [vmem:[#allocation2 + $0x70] sm:$0xff]  ;;  %s382_s6 = sshll.u32 %s151_s5, 4  ;;  %s298_s16 = scalar_lea.hbm %s686_s2, %s395_s7 }
  0x1a   : > { %197 = vmatpush.msra.mxu0 %v180_v4  ;;  %226 = vmatpush.msra.mxu1 %v168_v6  ;;  %v166_v11 = vld [vmem:[#allocation2 + $0x28] sm:$0xff]  ;;  %v248_v12 = vld [vmem:[#allocation2 + $0xb0] sm:$0xff]  ;;  %v165_v14 = vld [vmem:[#allocation2 + $0x20] sm:$0xff]  ;;  %s405_s29 = smul.u32 24, %s640_s28  ;;  %s153_s17 = scalar_lea.vmem [#allocation5], %s382_s6 }
  0x1b   : > { %397 = vmatpush.msra.mxu3 %v180_v4  ;;  %268 = vmatpush.msra.mxu2 %v250_v5  ;;  %v177_v13 = vld [vmem:[#allocation2 + $0x68] sm:$0xff]  ;;  %v176_v16 = vld [vmem:[#allocation2 + $0x60] sm:$0xff]  ;;  %v164_v17 = vld [vmem:[#allocation2 + $0x18] sm:$0xff]  ;;  %s299_s21 = sshll.u32 %s153_s17, 4  ;;  %s301_s22 = sshll.u32 %s298_s16, 4  ;;  %s300_s21 = int_to_ptr.vmem [resolvable:$true] %s299_s21  ;;  %s302_s22 = int_to_ptr.hbm [resolvable:$true] %s301_s22 }
  0x1c   : > { %198 = vmatpush.msra.mxu0 %v179_v7  ;;  %227 = vmatpush.msra.mxu1 %v167_v8  ;;  %v247_v15 = vld [vmem:[#allocation2 + $0xa8] sm:$0xff]  ;;  %v246_v18 = vld [vmem:[#allocation2 + $0xa0] sm:$0xff]  ;;  %v175_v19 = vld [vmem:[#allocation2 + $0x58] sm:$0xff]  ;;  %s158_s4 = scalar_lea.vmem %s684_s0, %s405_s29  ;;  %s287_s13 = scalar_lea.sflag [#allocation4], %s151_s5 }
  0x1d   : > { %398 = vmatpush.msra.mxu3 %v179_v7  ;;  %269 = vmatpush.msra.mxu2 %v249_v9  ;;  %v163_v20 = vld [vmem:[#allocation2 + $0x10] sm:$0xff]  ;;  %v245_v21 = vld [vmem:[#allocation2 + $0x98] sm:$0xff]  ;;  %v162_v23 = vld [vmem:[#allocation2 + $0x8] sm:$0xff]  ;;  %s504_s23 = sshra.s32 %s302_s22, 4  ;;  %s510_s27 = scalar_lea.hbm %s686_s2, 32  ;;  %s505_s23 = int_to_ptr.hbm [resolvable:$true] %s504_s23 }
  0x1e   : > { %199 = vmatpush.msra.mxu0 %v178_v10  ;;  %228 = vmatpush.msra.mxu1 %v166_v11  ;;  %v174_v22 = vld [vmem:[#allocation2 + $0x50] sm:$0xff]  ;;  %v173_v25 = vld [vmem:[#allocation2 + $0x48] sm:$0xff]  ;;  %v161_v27 = vld [vmem:[#allocation2] sm:$0xff]  ;;  %s506_s24 = scalar_lea.hbm %s505_s23, 16  ;;  %p511_p3 = scmp.lt.s32.totalorder %s505_s23, %s686_s2 }
  0x1f   : > { %399 = vmatpush.msra.mxu3 %v178_v10  ;;  %270 = vmatpush.msra.mxu2 %v248_v12  ;;  %v244_v24 = vld [vmem:[#allocation2 + $0x90] sm:$0xff]  ;;  %v241_v26 = vld [vmem:[%s158_s4 + $0x2] sm:$0xff]  ;;  %p507_p0 = scmp.ne.s32.totalorder %s505_s23, %s506_s24  ;;  %p512_p4 = scmp.lt.s32.totalorder %s510_s27, %s506_s24 }
  0x20   : > { %200 = vmatpush.msra.mxu0 %v177_v13  ;;  %229 = vmatpush.msra.mxu1 %v165_v14  ;;  %v170_v28 = vld [vmem:[%s158_s4 + $0x1] sm:$0xff]  ;;  %v171_v30 = vld [vmem:[%s158_s4 + $0x9] sm:$0xff] }
  0x21   : > { %400 = vmatpush.msra.mxu3 %v177_v13  ;;  %271 = vmatpush.msra.mxu2 %v247_v15  ;;  %v159_v29 = vld [vmem:[%s158_s4] sm:$0xff]  ;;  %v242_v31 = vld [vmem:[%s158_s4 + $0xa] sm:$0xff]  ;;  %p508_p1 = pnand %p507_p0, %p616_p5  ;;  %p513_p7 = por %p512_p4, %p511_p3 }
  0x22   : > { %201 = vmatpush.msra.mxu0 %v176_v16  ;;  %230 = vmatpush.msra.mxu1 %v164_v17  ;;  %v160_v32 = vld [vmem:[%s158_s4 + $0x8] sm:$0xff] }
  0x23   : > { %401 = vmatpush.msra.mxu3 %v176_v16  ;;  %272 = vmatpush.msra.mxu2 %v246_v18  ;;  %p509_p2 = pneg %p508_p1 }
  0x24   : > { %202 = vmatpush.msra.mxu0 %v175_v19  ;;  %231 = vmatpush.msra.mxu1 %v163_v20 }
  0x25   : > { %402 = vmatpush.msra.mxu3 %v175_v19  ;;  %273 = vmatpush.msra.mxu2 %v245_v21  ;;  %p514_p8 = pnand %p513_p7, %p509_p2 }
  0x26   : > { %203 = vmatpush.msra.mxu0 %v174_v22  ;;  %232 = vmatpush.msra.mxu1 %v162_v23 }
  0x27   : > { %403 = vmatpush.msra.mxu3 %v174_v22  ;;  %274 = vmatpush.msra.mxu2 %v244_v24 }
  0x28   : > { %204 = vmatpush.msra.mxu0 %v173_v25  ;;  %388 = vmatmul.msk.f32.vlgmr.msra.gmra.mxu2 %vm182_vm0, %v241_v26 }
  0x29   : > { %233 = vmatpush.msra.mxu1 %v161_v27  ;;  %384 = vmatmul.msk.f32.vlgmr.msra.gmra.mxu0 %vm182_vm0, %v170_v28 }
  0x2a   : > { %386 = vmatmul.msk.f32.vlgmr.msra.gmra.mxu1 %vm182_vm0, %v159_v29  ;;  %404 = vmatpush.msra.mxu3 %v173_v25 }
  0x2b   : > { %385 = vmatmul.msk.f32.vlgmr.msra.gmra.mxu3 %vm182_vm0, %v171_v30 }
  0x30   : > { %389 = vmatmul.msk.f32.gmra.mxu2 %vm182_vm0, %v242_v31 }
  0x32   : > { %387 = vmatmul.msk.f32.gmra.mxu1 %vm182_vm0, %v160_v32 }
  0xa6   : > { %v206_v33 = vpop.f32.mrf.mxu0 }
  0xa7   : > { %v235_v34 = vpop.f32.mrf.mxu1 }
  0xa8   : > { %v236_v35 = vadd.f32 %v235_v34, %v206_v33 }
  0xab   : > { %v276_v36 = vpop.f32.mrf.mxu2 }
  0xac   : > { %v282_v37 = vadd.f32 %v276_v36, %v236_v35 }
  0xae   : > { %284 = vst [vmem:[%s153_s17] sm:$0xff] %v282_v37  ;;  %v209_v38 = vpop.f32.mrf.mxu3 }
  0xaf   : > { %v238_v39 = vpop.f32.mrf.mxu1 }
  0xb0   : > { %v239_v40 = vadd.f32 %v238_v39, %v209_v38 }
  0xb3   : > { %v279_v41 = vpop.f32.mrf.mxu2 }
  0xb4   : > { %v283_v42 = vadd.f32 %v279_v41, %v239_v40 }
  0xb6   : > { %285 = vst [vmem:[%s153_s17 + $0x8] sm:$0xff] %v283_v42 }
  0xb7   : > { %517 = shalt.err (!%p514_p8)
}
  0xb8   : > { %s561_s30 = smov 128   ;;  %s562_s3 = smov 8  }
  0xb9   : > { %410 = dma.vmem_to_hbm [thread:$0]  (%p616_p5), %s300_s21, 256, %s302_s22, %s287_s13, %s561_s30, %s561_s30, %s562_s3  }
  0xba PF: > { %p422_p9 = scmp.ge.s32.totalorder %s556_s12, 2  ;;  %s316_s4 = sand.u32 1, %s544_s9  }
  0xbb   : > { %s317_s5 = scalar_lea.sflag [#allocation4], %s316_s4 }
  0xbc   : > { %p417_p10 = pnand %p422_p9, %p620_p6 }
  0xbe   : > { %p418_p11 = pneg %p417_p10 }
  0xc0   : > { %539 = dma.done.wait (%p418_p11), %s317_s5, 256  }
  0xc1   : > { %541 = vsyncadd (%p418_p11), %s317_s5, 4294967040  ;;  %p13_p12 = scmp.ge.s32.totalorder %s603_s15, 4   ;;  %s689_s9 = smov %s548_s10 }
  0xc2   : > { %s690_s10 = smov %s552_s11  ;;  %s691_s11 = smov %s614_s18 }
  0xc3   : > { %s692_s12 = smov %s603_s15  ;;  %15 = sbr.rel (!%p13_p12) target bundleno = 4 (0x4), region = 70 }
  0xc8   :  { %323 = vsyncpa [#allocation3], 1 }
  0xc9   :  { %325 = vsyncpa [#allocation3 + $0x1], 1 }
  0xca   :  { %326 = vsyncpa [#allocation4], 1 }
  0xcb   :  { %328 = vsyncpa [#allocation4 + $0x1], 1 }

</bundles_post_ra>
